<compile_context>
chip_gen: v6e
topology: v6e:2x2x1
jax: 0.10.0
libtpu: 0.0.40
codegen_flags: <defaults>
</compile_context>

<pallas_src>
import functools

import jax
import jax.numpy as jnp
import numpy as np
from jax import lax
from jax.experimental import pallas as pl
from jax.experimental.pallas import tpu as pltpu


# ---------------------------------------------------------------------------
# helpers
# ---------------------------------------------------------------------------
def _layernorm(x, w, b, eps=1e-12):
    # TF-style LayerNorm (eps inside the sqrt), f32.
    u = jnp.mean(x, axis=-1, keepdims=True)
    s = jnp.mean((x - u) ** 2, axis=-1, keepdims=True)
    return w * ((x - u) / jnp.sqrt(s + eps)) + b


def _pick_tile(S, target=256):
    """Largest divisor of S that is <= target and a multiple of 8 (fallback S)."""
    if S <= target:
        return S
    for t in range(min(target, S), 7, -1):
        if S % t == 0 and t % 8 == 0:
            return t
    return S


# ---------------------------------------------------------------------------
# Kernel A: q/k/v = LN1(x) @ [Wq*scale | Wk | Wv] + [bq*scale | bk | bv]
# Grid (B, S // ts); one fused (D, 3D) bf16 matmul per tile.
# ---------------------------------------------------------------------------
def _qkv_kernel(x_ref, ln1_w, ln1_b, wqkv, bqkv, q_ref, k_ref, v_ref):
    x = x_ref[0]                                            # (ts, D) f32
    D = x.shape[-1]
    y = _layernorm(x, ln1_w[0], ln1_b[0])                   # f32
    qkv = jnp.dot(y.astype(jnp.bfloat16), wqkv[...],
                  preferred_element_type=jnp.float32) + bqkv[0]   # (ts, 3D) f32
    q_ref[0] = qkv[:, :D].astype(jnp.bfloat16)
    k_ref[0] = qkv[:, D:2 * D].astype(jnp.bfloat16)
    v_ref[0] = qkv[:, 2 * D:].astype(jnp.bfloat16)


# ---------------------------------------------------------------------------
# Kernel B: per-query-tile attention (+ output proj) and tanh-gated residuals
# + FFN.  Grid (B, S // ts); k/v block index is constant along the tile axis,
# so Pallas DMAs them once per batch element.
# ---------------------------------------------------------------------------
def _attn_ffn_kernel(n_head,
                     x_ref, q_ref, k_ref, v_ref,
                     wo, bo, ln2_w, ln2_b, wfc, bfc, wpr, bpr,
                     gates, o_ref, attn_acc):
    x = x_ref[0]                                            # (ts, D) f32
    q = q_ref[0]                                            # (ts, D) bf16 (scale folded)
    k = k_ref[0]                                            # (S,  D) bf16
    v = v_ref[0]                                            # (S,  D) bf16
    D = x.shape[-1]
    hd = D // n_head

    # contract last dims of both operands (A @ B^T) -- no explicit transpose op
    dn = (((1,), (1,)), ((), ()))
    for h in range(n_head):                                 # static unroll
        lo, hi = h * hd, (h + 1) * hd
        s = lax.dot_general(q[:, lo:hi], k[:, lo:hi], dn,
                            preferred_element_type=jnp.float32)      # (ts, S) f32
        s = s - jnp.max(s, axis=-1, keepdims=True)
        p = jnp.exp(s)
        p = p * pl.reciprocal(jnp.sum(p, axis=-1, keepdims=True), approx=True)
        # write the head's context straight into the output-proj input slab
        attn_acc[:, lo:hi] = jnp.dot(p.astype(jnp.bfloat16), v[:, lo:hi],
                                     preferred_element_type=jnp.float32)

    attn = jnp.dot(attn_acc[...].astype(jnp.bfloat16), wo[...],
                   preferred_element_type=jnp.float32) + bo[0]
    x1 = x + gates[0] * attn                                # gates[0] = tanh(alpha_attn)

    y2 = _layernorm(x1, ln2_w[0], ln2_b[0])
    h1 = jnp.dot(y2.astype(jnp.bfloat16), wfc[...],
                 preferred_element_type=jnp.float32) + bfc[0]
    h1 = h1 * jax.nn.sigmoid(1.702 * h1)                    # QuickGELU (f32, EUP)
    mlp = jnp.dot(h1.astype(jnp.bfloat16), wpr[...],
                  preferred_element_type=jnp.float32) + bpr[0]
    o_ref[0] = x1 + gates[1] * mlp                          # gates[1] = tanh(alpha_dense)


# ---------------------------------------------------------------------------
# Wrapper
# ---------------------------------------------------------------------------
def gated_residual_attention_block(x_sbd, params, n_head, *, seq_tile=256):
    """x_sbd: (S, B, D) float32.  Returns (S, B, D) float32."""
    S, B, D = x_sbd.shape
    assert D % n_head == 0
    H = params["wfc"].shape[1]
    hd = D // n_head
    scale = 1.0 / np.sqrt(hd)

    f32 = lambda a: jnp.asarray(a, jnp.float32)
    bf16 = lambda a: jnp.asarray(a, jnp.bfloat16)
    vec = lambda a: f32(a).reshape(1, -1)

    # (S,B,D) -> (B,S,D); this is an extra HBM pass -- fuse/avoid in real models.
    x_bsd = jnp.transpose(x_sbd, (1, 0, 2)).astype(jnp.float32)

    # One-time weight transforms: fuse QKV, fold the 1/sqrt(hd) scale into Q.
    wqkv = jnp.concatenate([f32(params["wq"]) * scale, f32(params["wk"]),
                            f32(params["wv"])], axis=1)               # (D, 3D)
    bqkv = jnp.concatenate([f32(params["bq"]) * scale, f32(params["bk"]),
                            f32(params["bv"])]).reshape(1, -1)        # (1, 3D)
    gates = jnp.stack([jnp.tanh(f32(params["alpha_attn"])),
                       jnp.tanh(f32(params["alpha_dense"]))])         # (2,)

    ts = _pick_tile(S, seq_tile)
    n_tiles = S // ts

    cparams = pltpu.CompilerParams(
        dimension_semantics=("parallel", "parallel"),
        vmem_limit_bytes=48 * 1024 * 1024,   # leave headroom on v7x (64 MiB VMEM)
    )
    rep2 = lambda shape: pl.BlockSpec(shape, lambda b, i: (0, 0))
    tile_spec = pl.BlockSpec((1, ts, D), lambda b, i: (b, i, 0))
    full_seq = pl.BlockSpec((1, S, D), lambda b, i: (b, 0, 0))

    # -------- pass 1: fused QKV projection (bf16 MXU, f32 accumulate) --------
    q, k, v = pl.pallas_call(
        _qkv_kernel,
        grid=(B, n_tiles),
        out_shape=(jax.ShapeDtypeStruct((B, S, D), jnp.bfloat16),) * 3,
        in_specs=[
            tile_spec,                                   # x tile
            rep2((1, D)), rep2((1, D)),                  # ln1 w, b
            rep2((D, 3 * D)), rep2((1, 3 * D)),          # fused Wqkv, bqkv
        ],
        out_specs=[tile_spec] * 3,
        compiler_params=cparams,
    )(x_bsd, vec(params["ln1_w"]), vec(params["ln1_b"]), bf16(wqkv), bqkv)

    # -------- pass 2: attention + gated residual + FFN, tiled over queries ---
    kernel = functools.partial(_attn_ffn_kernel, n_head)
    out = pl.pallas_call(
        kernel,
        grid=(B, n_tiles),
        out_shape=jax.ShapeDtypeStruct((B, S, D), jnp.float32),
        in_specs=[
            tile_spec,                                   # x tile (f32)
            tile_spec,                                   # q tile (bf16)
            full_seq,                                    # k (full seq, bf16)
            full_seq,                                    # v (full seq, bf16)
            rep2((D, D)), rep2((1, D)),                  # wo, bo
            rep2((1, D)), rep2((1, D)),                  # ln2 w, b
            rep2((D, H)), rep2((1, H)),                  # c_fc
            rep2((H, D)), rep2((1, D)),                  # c_proj
            pl.BlockSpec(memory_space=pltpu.MemorySpace.SMEM),   # gates
        ],
        out_specs=tile_spec,
        scratch_shapes=[pltpu.VMEM((ts, D), jnp.float32)],   # attention context slab
        compiler_params=cparams,
    )(x_bsd, q, k, v,
      bf16(params["wo"]), vec(params["bo"]),
      vec(params["ln2_w"]), vec(params["ln2_b"]),
      bf16(params["wfc"]), vec(params["bfc"]),
      bf16(params["wpr"]), vec(params["bpr"]),
      gates)

    return jnp.transpose(out, (1, 0, 2))


# ---------------------------------------------------------------------------
# Pure-JAX f32 reference (mirrors the PyTorch forward exactly)
# ---------------------------------------------------------------------------
def reference(x_sbd, p, n_head):
    x = x_sbd.astype(jnp.float32)
    S, B, D = x.shape
    hd = D // n_head

    def ln(t, w, b, eps=1e-12):
        u = t.mean(-1, keepdims=True)
        s = ((t - u) ** 2).mean(-1, keepdims=True)
        return w * ((t - u) / jnp.sqrt(s + eps)) + b

    y = ln(x, p["ln1_w"], p["ln1_b"])
    q = y @ p["wq"] + p["bq"]
    k = y @ p["wk"] + p["bk"]
    v = y @ p["wv"] + p["bv"]

    def split(t):  # (S, B, D) -> (B, n_head, S, hd)
        return t.reshape(S, B, n_head, hd).transpose(1, 2, 0, 3)

    qh, kh, vh = split(q) / np.sqrt(hd), split(k), split(v)
    att = jax.nn.softmax(qh @ kh.transpose(0, 1, 3, 2), axis=-1)
    o = (att @ vh).transpose(2, 0, 1, 3).reshape(S, B, D)
    o = o @ p["wo"] + p["bo"]
    x = x + jnp.tanh(p["alpha_attn"]) * o

    y2 = ln(x, p["ln2_w"], p["ln2_b"])
    h = y2 @ p["wfc"] + p["bfc"]
    h = h * jax.nn.sigmoid(1.702 * h)
    m = h @ p["wpr"] + p["bpr"]
    x = x + jnp.tanh(p["alpha_dense"]) * m
    return x


# ---------------------------------------------------------------------------
if __name__ == "__main__":
    S, B, D, n_head = 8, 2, 32, 4
    H = int(4.0 * D)   # mlp_ratio = 4.0

    key = jax.random.PRNGKey(0)
    ks = jax.random.split(key, 12)

    def init(k, shape, scale=0.05):
        return scale * jax.random.normal(k, shape, dtype=jnp.float32)

    # Weights stored in "applied" form: y = x @ W + b.  alpha_* set nonzero so
    # the gated branches contribute (module init 0.0 would zero them out).
    params = {
        "ln1_w": jnp.ones((D,), jnp.float32),
        "ln1_b": jnp.zeros((D,), jnp.float32),
        "wq": init(ks[0], (D, D)), "bq": init(ks[1], (D,)),
        "wk": init(ks[2], (D, D)), "bk": init(ks[3], (D,)),
        "wv": init(ks[4], (D, D)), "bv": init(ks[5], (D,)),
        "wo": init(ks[6], (D, D)), "bo": init(ks[7], (D,)),
        "ln2_w": jnp.ones((D,), jnp.float32),
        "ln2_b": jnp.zeros((D,), jnp.float32),
        "wfc": init(ks[8], (D, H)), "bfc": init(ks[9], (H,)),
        "wpr": init(ks[10], (H, D)), "bpr": init(ks[11], (D,)),
        "alpha_attn": jnp.float32(0.3),
        "alpha_dense": jnp.float32(0.7),
    }

    x = jax.random.normal(jax.random.PRNGKey(1), (S, B, D), dtype=jnp.float32)

    out = gated_residual_attention_block(x, params, n_head)
    out = jax.block_until_ready(out)

    ref = reference(x, params, n_head)
    # bf16 matmul inputs (f32 accumulation) -> tolerance relaxed vs pure-f32.
    np.testing.assert_allclose(np.asarray(out), np.asarray(ref),
                               rtol=2e-2, atol=2e-2)
    print("KERNEL_OK")
</pallas_src>

<mosaic_0001>
module attributes {stable_mosaic.version = 11 : i64} {
  func.func @_qkv_kernel(%arg0: i32, %arg1: i32, %arg2: memref<1x8x32xf32, #tpu.memory_space<vmem>>, %arg3: memref<1x32xf32, #tpu.memory_space<vmem>>, %arg4: memref<1x32xf32, #tpu.memory_space<vmem>>, %arg5: memref<32x96xbf16, #tpu.memory_space<vmem>>, %arg6: memref<1x96xf32, #tpu.memory_space<vmem>>, %arg7: memref<1x8x32xbf16, #tpu.memory_space<vmem>>, %arg8: memref<1x8x32xbf16, #tpu.memory_space<vmem>>, %arg9: memref<1x8x32xbf16, #tpu.memory_space<vmem>>) attributes {dimension_semantics = [#tpu.dimension_semantics<parallel>, #tpu.dimension_semantics<parallel>], iteration_bounds = array<i64: 2, 1>, scalar_prefetch = 0 : i64, scratch_operands = 0 : i64, tpu.core_type = #tpu.core_type<tc>, window_params = [{transform_indices = @transform_0, window_bounds = array<i64: 1, 8, 32>}, {pipeline_mode = #tpu.pipeline_mode<synchronous>, transform_indices = @transform_1, window_bounds = array<i64: 1, 32>}, {pipeline_mode = #tpu.pipeline_mode<synchronous>, transform_indices = @transform_2, window_bounds = array<i64: 1, 32>}, {pipeline_mode = #tpu.pipeline_mode<synchronous>, transform_indices = @transform_3, window_bounds = array<i64: 32, 96>}, {pipeline_mode = #tpu.pipeline_mode<synchronous>, transform_indices = @transform_4, window_bounds = array<i64: 1, 96>}, {transform_indices = @transform_5, window_bounds = array<i64: 1, 8, 32>}, {transform_indices = @transform_6, window_bounds = array<i64: 1, 8, 32>}, {transform_indices = @transform_7, window_bounds = array<i64: 1, 8, 32>}]} {
    %c0 = arith.constant 0 : index
    %c0_0 = arith.constant 0 : index
    %c0_1 = arith.constant 0 : index
    %0 = vector.load %arg2[%c0, %c0_0, %c0_1] : memref<1x8x32xf32, #tpu.memory_space<vmem>>, vector<1x8x32xf32>
    %1 = vector.shape_cast %0 : vector<1x8x32xf32> to vector<8x32xf32>
    %c0_2 = arith.constant 0 : index
    %c0_3 = arith.constant 0 : index
    %2 = vector.load %arg3[%c0_2, %c0_3] : memref<1x32xf32, #tpu.memory_space<vmem>>, vector<1x32xf32>
    %3 = vector.shape_cast %2 : vector<1x32xf32> to vector<32xf32>
    %c0_4 = arith.constant 0 : index
    %c0_5 = arith.constant 0 : index
    %4 = vector.load %arg4[%c0_4, %c0_5] : memref<1x32xf32, #tpu.memory_space<vmem>>, vector<1x32xf32>
    %5 = vector.shape_cast %4 : vector<1x32xf32> to vector<32xf32>
    %cst = arith.constant dense<0.000000e+00> : vector<8xf32>
    %6 = vector.multi_reduction <add>, %1, %cst [1] : vector<8x32xf32> to vector<8xf32>
    %7 = vector.shape_cast %6 : vector<8xf32> to vector<8x1xf32>
    %cst_6 = arith.constant 3.200000e+01 : f32
    %8 = vector.broadcast %cst_6 : f32 to vector<8x1xf32>
    %9 = arith.divf %7, %8 : vector<8x1xf32>
    %10 = vector.broadcast %9 : vector<8x1xf32> to vector<8x32xf32>
    %11 = arith.subf %1, %10 : vector<8x32xf32>
    %12 = arith.mulf %11, %11 : vector<8x32xf32>
    %cst_7 = arith.constant dense<0.000000e+00> : vector<8xf32>
    %13 = vector.multi_reduction <add>, %12, %cst_7 [1] : vector<8x32xf32> to vector<8xf32>
    %14 = vector.shape_cast %13 : vector<8xf32> to vector<8x1xf32>
    %cst_8 = arith.constant 3.200000e+01 : f32
    %15 = vector.broadcast %cst_8 : f32 to vector<8x1xf32>
    %16 = arith.divf %14, %15 : vector<8x1xf32>
    %17 = vector.broadcast %9 : vector<8x1xf32> to vector<8x32xf32>
    %18 = arith.subf %1, %17 : vector<8x32xf32>
    %cst_9 = arith.constant 9.99999996E-13 : f32
    %19 = vector.broadcast %cst_9 : f32 to vector<8x1xf32>
    %20 = arith.addf %16, %19 : vector<8x1xf32>
    %21 = math.sqrt %20 : vector<8x1xf32>
    %22 = vector.broadcast %21 : vector<8x1xf32> to vector<8x32xf32>
    %23 = arith.divf %18, %22 : vector<8x32xf32>
    %24 = vector.shape_cast %3 : vector<32xf32> to vector<1x32xf32>
    %25 = vector.broadcast %24 : vector<1x32xf32> to vector<8x32xf32>
    %26 = arith.mulf %25, %23 : vector<8x32xf32>
    %27 = vector.shape_cast %5 : vector<32xf32> to vector<1x32xf32>
    %28 = vector.broadcast %27 : vector<1x32xf32> to vector<8x32xf32>
    %29 = arith.addf %26, %28 : vector<8x32xf32>
    %30 = arith.truncf %29 : vector<8x32xf32> to vector<8x32xbf16>
    %c0_10 = arith.constant 0 : index
    %c0_11 = arith.constant 0 : index
    %31 = vector.load %arg5[%c0_10, %c0_11] : memref<32x96xbf16, #tpu.memory_space<vmem>>, vector<32x96xbf16>
    %cst_12 = arith.constant dense<0.000000e+00> : vector<8x96xf32>
    %32 = tpu.matmul %30, %31, %cst_12 {dimension_numbers = #tpu.dot_dimension_numbers<[1], [0], [0], [1], [0, 0, 1, 1], [], []>} : vector<8x32xbf16>, vector<32x96xbf16>, vector<8x96xf32> -> vector<8x96xf32>
    %c0_13 = arith.constant 0 : index
    %c0_14 = arith.constant 0 : index
    %33 = vector.load %arg6[%c0_13, %c0_14] : memref<1x96xf32, #tpu.memory_space<vmem>>, vector<1x96xf32>
    %34 = vector.shape_cast %33 : vector<1x96xf32> to vector<96xf32>
    %35 = vector.shape_cast %34 : vector<96xf32> to vector<1x96xf32>
    %36 = vector.broadcast %35 : vector<1x96xf32> to vector<8x96xf32>
    %37 = arith.addf %32, %36 : vector<8x96xf32>
    %38 = vector.extract_strided_slice %37 {offsets = [0, 0], sizes = [8, 32], strides = [1, 1]} : vector<8x96xf32> to vector<8x32xf32>
    %39 = arith.truncf %38 : vector<8x32xf32> to vector<8x32xbf16>
    %c0_15 = arith.constant 0 : index
    %c0_16 = arith.constant 0 : index
    %c0_17 = arith.constant 0 : index
    %40 = vector.load %arg7[%c0_15, %c0_16, %c0_17] : memref<1x8x32xbf16, #tpu.memory_space<vmem>>, vector<1x8x32xbf16>
    %41 = vector.shape_cast %40 : vector<1x8x32xbf16> to vector<8x32xbf16>
    %42 = vector.shape_cast %39 : vector<8x32xbf16> to vector<1x8x32xbf16>
    tpu.vector_store %arg7[%c0_15, %c0_16, %c0_17], %42 {strides = array<i32>} : memref<1x8x32xbf16, #tpu.memory_space<vmem>>, vector<1x8x32xbf16>,
    %43 = vector.extract_strided_slice %37 {offsets = [0, 32], sizes = [8, 32], strides = [1, 1]} : vector<8x96xf32> to vector<8x32xf32>
    %44 = arith.truncf %43 : vector<8x32xf32> to vector<8x32xbf16>
    %c0_18 = arith.constant 0 : index
    %c0_19 = arith.constant 0 : index
    %c0_20 = arith.constant 0 : index
    %45 = vector.load %arg8[%c0_18, %c0_19, %c0_20] : memref<1x8x32xbf16, #tpu.memory_space<vmem>>, vector<1x8x32xbf16>
    %46 = vector.shape_cast %45 : vector<1x8x32xbf16> to vector<8x32xbf16>
    %47 = vector.shape_cast %44 : vector<8x32xbf16> to vector<1x8x32xbf16>
    tpu.vector_store %arg8[%c0_18, %c0_19, %c0_20], %47 {strides = array<i32>} : memref<1x8x32xbf16, #tpu.memory_space<vmem>>, vector<1x8x32xbf16>,
    %48 = vector.extract_strided_slice %37 {offsets = [0, 64], sizes = [8, 32], strides = [1, 1]} : vector<8x96xf32> to vector<8x32xf32>
    %49 = arith.truncf %48 : vector<8x32xf32> to vector<8x32xbf16>
    %c0_21 = arith.constant 0 : index
    %c0_22 = arith.constant 0 : index
    %c0_23 = arith.constant 0 : index
    %50 = vector.load %arg9[%c0_21, %c0_22, %c0_23] : memref<1x8x32xbf16, #tpu.memory_space<vmem>>, vector<1x8x32xbf16>
    %51 = vector.shape_cast %50 : vector<1x8x32xbf16> to vector<8x32xbf16>
    %52 = vector.shape_cast %49 : vector<8x32xbf16> to vector<1x8x32xbf16>
    tpu.vector_store %arg9[%c0_21, %c0_22, %c0_23], %52 {strides = array<i32>} : memref<1x8x32xbf16, #tpu.memory_space<vmem>>, vector<1x8x32xbf16>,
    return
  }
  func.func @transform_0(%arg0: i32, %arg1: i32) -> (i32, i32, i32) {
    %c0_i32 = arith.constant 0 : i32
    %c0_i32_0 = arith.constant 0 : i32
    return %arg0, %arg1, %c0_i32 : i32, i32, i32
  }
  func.func @transform_1(%arg0: i32, %arg1: i32) -> (i32, i32) {
    %c0_i32 = arith.constant 0 : i32
    %c0_i32_0 = arith.constant 0 : i32
    %c0_i32_1 = arith.constant 0 : i32
    return %c0_i32, %c0_i32_0 : i32, i32
  }
  func.func @transform_2(%arg0: i32, %arg1: i32) -> (i32, i32) {
    %c0_i32 = arith.constant 0 : i32
    %c0_i32_0 = arith.constant 0 : i32
    %c0_i32_1 = arith.constant 0 : i32
    return %c0_i32, %c0_i32_0 : i32, i32
  }
  func.func @transform_3(%arg0: i32, %arg1: i32) -> (i32, i32) {
    %c0_i32 = arith.constant 0 : i32
    %c0_i32_0 = arith.constant 0 : i32
    %c0_i32_1 = arith.constant 0 : i32
    return %c0_i32, %c0_i32_0 : i32, i32
  }
  func.func @transform_4(%arg0: i32, %arg1: i32) -> (i32, i32) {
    %c0_i32 = arith.constant 0 : i32
    %c0_i32_0 = arith.constant 0 : i32
    %c0_i32_1 = arith.constant 0 : i32
    return %c0_i32, %c0_i32_0 : i32, i32
  }
  func.func @transform_5(%arg0: i32, %arg1: i32) -> (i32, i32, i32) {
    %c0_i32 = arith.constant 0 : i32
    %c0_i32_0 = arith.constant 0 : i32
    return %arg0, %arg1, %c0_i32 : i32, i32, i32
  }
  func.func @transform_6(%arg0: i32, %arg1: i32) -> (i32, i32, i32) {
    %c0_i32 = arith.constant 0 : i32
    %c0_i32_0 = arith.constant 0 : i32
    return %arg0, %arg1, %c0_i32 : i32, i32, i32
  }
  func.func @transform_7(%arg0: i32, %arg1: i32) -> (i32, i32, i32) {
    %c0_i32 = arith.constant 0 : i32
    %c0_i32_0 = arith.constant 0 : i32
    return %arg0, %arg1, %c0_i32 : i32, i32, i32
  }
}

</mosaic_0001>

<bundles_post_ra>
// kernel: tpu_custom_call.1
= control target key start
LH: loop header
LB: loop body
LE: loop exit
PB: predicated region body
PF: predicated region fallthrough
CT: control target
= control target key end

     0   :  { %s1313_s0 = inlined_call_operand.hbm [shape: f32[2,8,32], index: 0, kind: input, shape index: {}]   ;;  %s1314_s1 = inlined_call_operand.vmem [shape: f32[1,32], index: 1, kind: input, shape index: {}]   ;;  %s1315_s2 = inlined_call_operand.vmem [shape: f32[1,32], index: 2, kind: input, shape index: {}]   ;;  %s1316_s3 = inlined_call_operand.hbm [shape: bf16[32,96], index: 3, kind: input, shape index: {}]   ;;  %s1317_s4 = inlined_call_operand.vmem [shape: f32[1,96], index: 4, kind: input, shape index: {}]   ;;  %s1318_s5 = inlined_call_operand.hbm [shape: bf16[2,8,32], index: 5, kind: output, shape index: {0}]   ;;  %s1319_s6 = inlined_call_operand.hbm [shape: bf16[2,8,32], index: 6, kind: output, shape index: {1}]   ;;  %s1320_s7 = inlined_call_operand.hbm [shape: bf16[2,8,32], index: 7, kind: output, shape index: {2}]  }
   0x1   :  { %1326 = sst [smem:[#allocation18_spill]] %s1316_s3 }
   0x2   :  { %13 = vsyncpa [#allocation3], 0 }
   0x3   :  { %15 = vsyncpa [#allocation3 + $0x1], 0 }
   0x4   :  { %16 = vsyncpa [#allocation6], 0 }
   0x5   :  { %17 = vsyncpa [#allocation4], 0 }
   0x6   :  { %19 = vsyncpa [#allocation4 + $0x1], 0 }
   0x7   :  { %20 = vsyncpa [#allocation9], 0 }
   0x8   :  { %22 = vsyncpa [#allocation9 + $0x1], 0  ;;  %s1057_s24 = smov 0   ;;  %s1059_s25 = smov 0  }
   0x9   :  { %s1061_s26 = smov 0   ;;  %s1063_s27 = smov 0  }
   0xa   :  { %s1065_s28 = smov 0   ;;  %s1067_s29 = smov 0  }
   0xb LB: > { %1327 = sst [smem:[#allocation15_spill]] %s1000_s28  ;;  %s1088_s30 = sadd.s32 4294967295, %s1004_s29   ;;  %s1004_s29 = sphi %s1067_s29, %s28_s29   ;;  %s1000_s28 = sphi %s1065_s28, %s1346_s28   ;;  %s996_s27 = sphi %s1063_s27, %s1345_s27   ;;  %s992_s26 = sphi %s1061_s26, %s1349_s26   ;;  %s988_s25 = sphi %s1059_s25, %s1348_s25   ;;  %s984_s24 = sphi %s1057_s24, %s1347_s24  }
   0xc   : > { %s1321_s8 = sadd.s32 4294967294, %s1004_s29   ;;  %p62_p0 = scmp.ne.s32.totalorder %s988_s25, %s984_s24 }
   0xd   : > { %p1325_p1 = scmp.eq.s32.totalorder %s1088_s30, 0  ;;  %p178_p3 = scmp.eq.s32.totalorder %s1321_s8, 1 }
   0xe   : > { %p677_p5 = scmp.ge.s32.totalorder %s1004_s29, 1  ;;  %p241_p7 = scmp.lt.s32.totalorder %s1004_s29, 3 }
   0xf   : > { %p1099_p4 = por %p1325_p1, %p62_p0  ;;  %p1104_p6 = por %p178_p3, %p62_p0 }
  0x10   : > { %p1109_p8 = pnand %p677_p5, %p241_p7  ;;  %s1006_s12 = smov [#allocation5]  }
  0x11   : > { %s1329_s10 = scalar_select %p1104_p6, 1, 0 }
  0x12   : > { %s259_s13 = sshll.u32 %s1006_s12, 4  ;;  %p727_p9 = pneg %p1109_p8  ;;  %s260_s13 = int_to_ptr.vmem [resolvable:$true] %s259_s13 }
  0x13   : > { %1330 = sst [smem:[#allocation16_spill]] %s1329_s10  ;;  %s40_s15 = sadd.s32 1, %s1000_s28 }
  0x14   : > { %p1118_p11 = pnand %p727_p9, %p1325_p1  ;;  %s821_s16 = scalar_lea.vmem %s260_s13, 256 }
  0x15   : > { %p822_p13 = scmp.ne.s32.totalorder %s260_s13, %s821_s16  ;;  %p829_p5 = scmp.lt.s32.totalorder %s260_s13, %s260_s13 }
  0x16   : > { %p812_p12 = pneg %p1118_p11  ;;  %p830_p7 = scmp.lt.s32.totalorder %s821_s16, %s821_s16 }
  0x18   : > { %p824_p0 = pnand %p822_p13, %p812_p12  ;;  %p831_p2 = por %p830_p7, %p829_p5 }
  0x1a   : > { %p825_p3 = pneg %p824_p0 }
  0x1c   : > { %p832_p6 = pnand %p831_p2, %p825_p3 }
  0x1e   : > { %835 = shalt.err (!%p832_p6)
}
  0x1f   : > { %s1007_s17 = smov 64   ;;  %s1008_s18 = smov 4  }
  0x20   : > { %s1333_s3 = sld [smem:[#allocation18_spill]]  ;;  %p42_p2 = scmp.ge.s32.totalorder %s40_s15, 2 }
  0x21   : > { %s49_s21 = sadd.s32 1, %s992_s26  ;;  %p56_p6 = scmp.ne.s32.totalorder %s992_s26, %s988_s25 }
  0x22   : > { %p57_p9 = scmp.eq.s32.totalorder %s1004_s29, 0  ;;  %s1351_s15 = smov (%p42_p2, %s40_s15), 0 }
  0x23   : > { %1334 = sst [smem:[#allocation17_spill]] %s1351_s15  ;;  %p1336_p13 = scmp.eq.s32.totalorder %s1088_s30, 1 }
  0x24   : > { %p1136_p12 = por %p57_p9, %p56_p6  ;;  %s44_s12 = ssub.s32 %s1000_s28, %s1351_s15 }
  0x25   : > { %p1142_p0 = por %p1336_p13, %p56_p6  ;;  %p746_p3 = scmp.lt.s32.totalorder %s1004_s29, 2 }
  0x26   : > { %730 = dma.hbm_to_vmem [thread:$0]  (!%p1118_p11), %s1333_s3, 256, %s260_s13, [#allocation6], %s1007_s17, %s1007_s17, %s1008_s18  }
  0x27   : > { %p47_p11 = scmp.eq.s32.totalorder %s44_s12, 0  ;;  %s276_s13 = sand.u32 1, %s992_s26  }
  0x28   : > { %s680_s14 = sshll.u32 %s276_s13, 3  ;;  %s681_s17 = sshll.u32 %s1000_s28, 7 }
  0x29   : > { %s1151_s16 = scalar_select %p47_p11, %s992_s26, %s49_s21  }
  0x2a   : > { %s286_s20 = scalar_lea.hbm %s1313_s0, %s681_s17  ;;  %s280_s8 = scalar_lea.vmem [#allocation2], %s680_s14 }
  0x2b   : > { %s288_s3 = sshll.u32 %s280_s8, 4  ;;  %p1159_p5 = pnand %p746_p3, %p1136_p12  ;;  %s289_s3 = int_to_ptr.vmem [resolvable:$true] %s288_s3 }
  0x2c   : > { %s277_s15 = scalar_lea.sflag [#allocation3], %s276_s13  ;;  %s849_s12 = scalar_lea.vmem %s289_s3, 128 }
  0x2d   : > { %p838_p7 = pneg %p1159_p5  ;;  %p850_p2 = scmp.ne.s32.totalorder %s289_s3, %s849_s12 }
  0x2e   : > { %s1009_s21 = smov [#allocation2]  }
  0x2f   : > { %p852_p6 = pnand %p850_p2, %p838_p7  ;;  %s854_s28 = sshll.u32 %s1009_s21, 4  ;;  %s855_s28 = int_to_ptr.vmem [resolvable:$false] %s854_s28 }
  0x30   : > { %s856_s17 = scalar_lea.vmem %s855_s28, 256  ;;  %p857_p13 = scmp.lt.s32.totalorder %s289_s3, %s855_s28 }
  0x31   : > { %p853_p9 = pneg %p852_p6  ;;  %p858_p11 = scmp.lt.s32.totalorder %s856_s17, %s849_s12 }
  0x33   : > { %p859_p10 = por %p858_p11, %p857_p13 }
  0x35   : > { %p860_p1 = pnand %p859_p10, %p853_p9 }
  0x37   : > { %863 = shalt.err (!%p860_p1)
}
  0x38   : > { %734 = dma.hbm_to_vmem [thread:$0]  (!%p1159_p5), %s286_s20, 128, %s289_s3, %s277_s15  }
  0x39   : > { %297 = sbr.rel (%p1109_p8) target bundleno = 742 (0x2e6), region = 40  ;;  %s1170_s8 = sand.u32 (!%p1109_p8), 1, %s988_s25  }
  0x3a   : > { %s683_s22 = sshll.u32 (!%p1109_p8), %s1170_s8, 3  ;;  %s300_s13 = scalar_lea.sflag (!%p1109_p8), [#allocation3], %s1170_s8 }
  0x3b   : > { %s303_s14 = scalar_lea.vmem (!%p1109_p8), [#allocation2], %s683_s22 }
  0x3e   : > { %967 = dma.done.wait (%p1099_p4), %s300_s13, 128  }
  0x3f   : > { %969 = vsyncadd (%p1099_p4), %s300_s13, 4294967168  ;;  %p1339_p1 = scmp.eq.s32.totalorder %s1088_s30, 0 }
  0x41   : > { %971 = dma.done.wait (%p1339_p1), [#allocation6], 256   ;;  %p1340_p10 = pmov %p1339_p1 }
  0x42   : > { %vm352_vm0 = vcmask 261120   ;;  %v349_v0 = vld [vmem:[%s303_s14] sm:$0xff]  ;;  %v804_v7 = vld [vmem:[#allocation5 + $0x8] sm:$0xff]   ;;  %v1010_v8 = vmov 0.0   ;;  %vm1011_vm1 = vmmov 0   ;;  %v805_v9 = vld [vmem:[#allocation5] sm:$0xff]  }
  0x43   : > { %973 = vsyncadd (%p1340_p10), [#allocation6], 4294967040  ;;  %v353_v1 = vsel %vm352_vm0, %v349_v0, 0.0  ;;  %707 = vmatprep.subr.bf16.mxu0 %v1010_v8  ;;  %711 = vmatprep.mubr.msk.bf16.mxu0 %vm1011_vm1, %v1010_v8  ;;  %v688_v19 = vld [vmem:[%s1314_s1] ss:$0 sm:$0xff]  ;;  %s1192_s11 = sshll.u32 %s1170_s8, 2 }
  0x44   : > { %354 = vadd.xlane.f32.xlu0 %v353_v1  ;;  %708 = vmatpush3.bf16.msra.mxu0 %v804_v7  ;;  %v689_v21 = vld [vmem:[%s1315_s2] ss:$0 sm:$0xff]  ;;  %s1198_s19 = sshll.u32 %s996_s27, 6  ;;  %s333_s20 = scalar_lea.vmem [#allocation7], %s1192_s11  ;;  %vm456_vm4 = vcmask 257024  }
  0x45   : > { %709 = vmatprep.subr.bf16.mxu0 %v1010_v8  ;;  %v690_v25 = vld [vmem:[%s1317_s4] ss:$0 sm:$0xff]  ;;  %s494_s12 = sshll.u32 %s333_s20, 4  ;;  %s1205_s22 = scalar_lea.hbm %s1318_s5, %s1198_s19  ;;  %s1207_s12 = int_to_ptr.vmem [resolvable:$true] %s494_s12 }
  0x46   : > { %s1012_s27 = smov 96   ;;  %s470_s13 = scalar_lea.sflag [#allocation4], %s1170_s8 }
  0x47   : > { %s864_s14 = scalar_lea.vmem %s1207_s12, 64  ;;  %s1013_s3 = smov [#allocation7]  }
  0x48   : > { %710 = vmatpush3.bf16.msra.mxu0 %v805_v9  ;;  %p865_p4 = scmp.ne.s32.totalorder %s1207_s12, %s864_s14  ;;  %s868_s28 = sshll.u32 %s1013_s3, 4  ;;  %s869_s28 = int_to_ptr.vmem [resolvable:$false] %s868_s28 }
  0x49   : > { %s870_s9 = scalar_lea.vmem %s869_s28, 128  ;;  %p871_p3 = scmp.lt.s32.totalorder %s1207_s12, %s869_s28 }
  0x4a   : > { %p866_p8 = pnand %p865_p4, %p1142_p0  ;;  %p872_p5 = scmp.lt.s32.totalorder %s870_s9, %s864_s14 }
  0x4c   : > { %p867_p12 = pneg %p866_p8  ;;  %p873_p7 = por %p872_p5, %p871_p3 }
  0x4e   : > { %p874_p2 = pnand %p873_p7, %p867_p12 }
  0xcd   : > { %v355_v2 = vpop.xlane.xlu0 %354 }
  0xce   : > { %v357_v3 = vmul.f32 0.03125, %v355_v2 }
  0xd0   : > { %v358_v4 = vsub.f32 %v349_v0, %v357_v3 }
  0xd2   : > { %v359_v5 = vmul.f32 %v358_v4, %v358_v4 }
  0xd4   : > { %v360_v6 = vsel %vm352_vm0, %v359_v5, 0.0 }
  0xd5   : > { %361 = vadd.xlane.f32.xlu0 %v360_v6 }
 0x15e   : > { %v362_v10 = vpop.xlane.xlu0 %361 }
 0x15f   : > { %v363_v11 = vmul.f32 0.03125, %v362_v10 }
 0x161   : > { %v364_v12 = vadd.f32 1e-12, %v363_v11 }
 0x163   : > { %806 = vrsqrt.f32 %v364_v12  ;;  %vm367_vm2 = vcmp.eq.f32.partialorder %v364_v12, inf  ;;  %v370_v15 = vand.u32 2147483648, %v364_v12  ;;  %vm369_vm3 = vcmp.eq.f32.partialorder %v364_v12, 0.0 }
 0x170   : > { %v807_v13 = vpop.eup %806 }
 0x171   : > { %v366_v14 = vmul.f32 %v807_v13, %v364_v12 }
 0x173   : > { %v368_v16 = vsel %vm367_vm2, %v364_v12, %v366_v14 }
 0x174   : > { %v371_v17 = vsel %vm369_vm3, %v370_v15, %v368_v16 }
 0x175   : > { %808 = vrcp.f32 %v371_v17 }
 0x182   : > { %v809_v18 = vpop.eup %808 }
 0x183   : > { %v373_v20 = vmul.f32 %v809_v18, %v358_v4 }
 0x185   : > { %v380_v22 = vmul.f32 %v688_v19, %v373_v20 }
 0x187   : > { %v387_v23 = vadd.f32 %v689_v21, %v380_v22 }
 0x189   : > { %v388_v24 = vpack.c.bf16 %v387_v23, %v387_v23 }
 0x18b   : > { %712 = vmatmul.mubr.msk.bf16.vlgmr.msra.gmra.mxu0 %vm352_vm0, %v388_v24 }
 0x24b   : > { %v449_v26 = vpop.f32.mrf.mxu0 }
 0x24c   : > { %v450_v27 = vadd.f32 %v690_v25, %v449_v26 }
 0x24d   : > { %v713_v28 = vpop.f32.mrf.mxu0 }
 0x24e   : > { %v455_v29 = vpack.c.bf16 %v450_v27, %v450_v27 }
 0x24f   : > { %v452_v30 = vpop.f32.mrf.mxu0 }
 0x250   : > { %461 = vrot.lane.b32.xlu1 %v455_v29, %s1012_s27  ;;  %457 = vst.msk [vmem:[%s333_s20] sm:$0xf] %vm456_vm4, %v455_v29 }
 0x251   : > { %v714_v31 = vpop.f32.mrf.mxu0 }
 0x252   : > { %877 = shalt.err (!%p874_p2)
}
 0x253   : > { %s878_s10 = scalar_lea.hbm %s1205_s22, 64  ;;  %s882_s18 = scalar_lea.hbm %s1318_s5, 128 }
 0x254   : > { %p879_p6 = scmp.ne.s32.totalorder %s1205_s22, %s878_s10  ;;  %p883_p11 = scmp.lt.s32.totalorder %s1205_s22, %s1318_s5 }
 0x255   : > { %p884_p1 = scmp.lt.s32.totalorder %s882_s18, %s878_s10 }
 0x256   : > { %p880_p9 = pnand %p879_p6, %p1142_p0 }
 0x257   : > { %p885_p10 = por %p884_p1, %p883_p11 }
 0x258   : > { %p881_p13 = pneg %p880_p9 }
 0x25a   : > { %p886_p4 = pnand %p885_p10, %p881_p13 }
 0x25c   : > { %889 = shalt.err (!%p886_p4)
}
 0x25d   : > { %721 = dma.vmem_to_hbm [thread:$0]  (%p1142_p0), %s1207_s12, 64, %s1205_s22, %s470_s13  }
 0x25e   : > { %s1014_s17 = smov 64   ;;  %s474_s27 = sand.u32 1, %s1088_s30  }
 0x25f   : > { %465 = vrot.lane.b32.xlu1 %v455_v29, %s1014_s17  ;;  %s340_s14 = scalar_lea.vmem [#allocation8], %s1192_s11  ;;  %s1237_s10 = scalar_lea.hbm %s1319_s6, %s1198_s19 }
 0x260   : > { %s508_s3 = sshll.u32 %s340_s14, 4  ;;  %s347_s8 = scalar_lea.vmem [#allocation10], %s1192_s11  ;;  %s1239_s3 = int_to_ptr.vmem [resolvable:$true] %s508_s3 }
 0x261   : > { %s522_s15 = sshll.u32 %s347_s8, 4  ;;  %s1245_s12 = scalar_lea.sflag [#allocation9], %s474_s27  ;;  %s523_s15 = int_to_ptr.vmem [resolvable:$true] %s522_s15 }
 0x262   : > { %s890_s30 = scalar_lea.vmem %s1239_s3, 64  ;;  %s1015_s22 = smov [#allocation8]  }
 0x263   : > { %p891_p8 = scmp.ne.s32.totalorder %s1239_s3, %s890_s30  ;;  %s894_s13 = sshll.u32 %s1015_s22, 4  ;;  %s895_s13 = int_to_ptr.vmem [resolvable:$false] %s894_s13 }
 0x264   : > { %s896_s18 = scalar_lea.vmem %s895_s13, 128  ;;  %p897_p5 = scmp.lt.s32.totalorder %s1239_s3, %s895_s13 }
 0x265   : > { %p892_p12 = pnand %p891_p8, %p1142_p0  ;;  %p898_p7 = scmp.lt.s32.totalorder %s896_s18, %s890_s30 }
 0x267   : > { %p893_p3 = pneg %p892_p12  ;;  %p899_p2 = por %p898_p7, %p897_p5 }
 0x269   : > { %p900_p6 = pnand %p899_p2, %p893_p3 }
 0x2c2   : > { %v462_v32 = vpop.permute.xlu1 %461 }
 0x2c3   : > { %464 = vst.msk [vmem:[%s340_s14] sm:$0xf] %vm456_vm4, %v462_v32 }
 0x2c4   : > { %903 = shalt.err (!%p900_p6)
}
 0x2c5   : > { %s904_s20 = scalar_lea.hbm %s1237_s10, 64  ;;  %s908_s27 = scalar_lea.hbm %s1319_s6, 128 }
 0x2c6   : > { %p905_p9 = scmp.ne.s32.totalorder %s1237_s10, %s904_s20  ;;  %p909_p1 = scmp.lt.s32.totalorder %s1237_s10, %s1319_s6 }
 0x2c7   : > { %p910_p10 = scmp.lt.s32.totalorder %s908_s27, %s904_s20 }
 0x2c8   : > { %p906_p13 = pnand %p905_p9, %p1142_p0 }
 0x2c9   : > { %p911_p4 = por %p910_p10, %p909_p1 }
 0x2ca   : > { %p907_p11 = pneg %p906_p13 }
 0x2cc   : > { %p912_p8 = pnand %p911_p4, %p907_p11 }
 0x2ce   : > { %915 = shalt.err (!%p912_p8)
}
 0x2cf   : > { %722 = dma.vmem_to_hbm [thread:$0]  (%p1142_p0), %s1239_s3, 64, %s1237_s10, %s1245_s12  }
 0x2d0   : > { %s520_s22 = scalar_lea.hbm %s1320_s7, %s1198_s19  ;;  %s916_s13 = scalar_lea.vmem %s523_s15, 64 }
 0x2d1   : > { %v466_v33 = vpop.permute.xlu1 %465  ;;  %p917_p12 = scmp.ne.s32.totalorder %s523_s15, %s916_s13  ;;  %s1016_s18 = smov [#allocation10]  }
 0x2d2   : > { %468 = vst.msk [vmem:[%s347_s8] sm:$0xf] %vm456_vm4, %v466_v33  ;;  %s920_s20 = sshll.u32 %s1016_s18, 4  ;;  %s921_s20 = int_to_ptr.vmem [resolvable:$false] %s920_s20 }
 0x2d3   : > { %p918_p3 = pnand %p917_p12, %p1142_p0  ;;  %s922_s21 = scalar_lea.vmem %s921_s20, 128 }
 0x2d4   : > { %p923_p7 = scmp.lt.s32.totalorder %s523_s15, %s921_s20  ;;  %p924_p2 = scmp.lt.s32.totalorder %s922_s21, %s916_s13 }
 0x2d5   : > { %p919_p5 = pneg %p918_p3 }
 0x2d6   : > { %p925_p6 = por %p924_p2, %p923_p7 }
 0x2d8   : > { %p926_p9 = pnand %p925_p6, %p919_p5 }
 0x2da   : > { %929 = shalt.err (!%p926_p9)
}
 0x2db   : > { %s930_s19 = scalar_lea.hbm %s520_s22, 64  ;;  %s934_s10 = scalar_lea.hbm %s1320_s7, 128 }
 0x2dc   : > { %p931_p13 = scmp.ne.s32.totalorder %s520_s22, %s930_s19  ;;  %p935_p10 = scmp.lt.s32.totalorder %s520_s22, %s1320_s7 }
 0x2dd   : > { %p936_p4 = scmp.lt.s32.totalorder %s934_s10, %s930_s19 }
 0x2de   : > { %p932_p11 = pnand %p931_p13, %p1142_p0 }
 0x2df   : > { %p937_p8 = por %p936_p4, %p935_p10 }
 0x2e0   : > { %p933_p1 = pneg %p932_p11 }
 0x2e2   : > { %p938_p12 = pnand %p937_p8, %p933_p1 }
 0x2e4   : > { %941 = shalt.err (!%p938_p12)
}
 0x2e5   : > { %723 = dma.vmem_to_hbm [thread:$0]  (%p1142_p0), %s523_s15, 64, %s520_s22, %s1245_s12  }
 0x2e6 PF: > { %s1341_s27 = sld [smem:[#allocation16_spill]]  ;;  %s534_s14 = sand.u32 1, %s984_s24  }
 0x2e7   : > { %p1343_p5 = scmp.ge.s32.totalorder %s1004_s29, 2  ;;  %s535_s28 = scalar_lea.sflag [#allocation4], %s534_s14 }
 0x2ec   : > { %p1342_p3 = scmp.ne.s32.totalorder %s1341_s27, 0 }
 0x2ee   : > { %p736_p7 = pnand %p1343_p5, %p1342_p3 }
 0x2f0   : > { %p737_p2 = pneg %p736_p7 }
 0x2f2   : > { %975 = dma.done.wait (%p737_p2), %s535_s28, 64  }
 0x2f3   : > { %977 = vsyncadd (%p737_p2), %s535_s28, 4294967232  ;;  %s1344_s9 = sadd.s32 4294967294, %s1004_s29  }
 0x2f4   : > { %s543_s30 = sand.u32 1, %s1344_s9  }
 0x2f5   : > { %s544_s13 = scalar_lea.sflag [#allocation9], %s543_s30 }
 0x2f6   : > { %979 = dma.done.wait (%p737_p2), %s544_s13, 128  }
 0x2f7   : > { %981 = vsyncadd (%p737_p2), %s544_s13, 4294967168  ;;  %s28_s29 = sadd.s32 1, %s1004_s29   ;;  %s1345_s27 = sld [smem:[#allocation15_spill]] }
 0x2f8   : > { %p25_p0 = scmp.ge.s32.totalorder %s28_s29, 4   ;;  %s1346_s28 = sld [smem:[#allocation17_spill]] }
 0x2f9   : > { %s1347_s24 = smov %s988_s25  ;;  %s1348_s25 = smov %s992_s26 }
 0x2fa   : > { %s1349_s26 = smov %s1151_s16  ;;  %27 = sbr.rel (!%p25_p0) target bundleno = 11 (0xb), region = 121 }
 0x2ff   :  { %558 = vsyncpa [#allocation3], 1 }
 0x300   :  { %560 = vsyncpa [#allocation3 + $0x1], 1 }
 0x301   :  { %561 = vsyncpa [#allocation6], 1 }
 0x302   :  { %562 = vsyncpa [#allocation4], 1 }
 0x303   :  { %564 = vsyncpa [#allocation4 + $0x1], 1 }
 0x304   :  { %565 = vsyncpa [#allocation9], 1 }
 0x305   :  { %567 = vsyncpa [#allocation9 + $0x1], 1 }

</bundles_post_ra>
